<compile_context>
chip_gen: v7x
topology: tpu7x:2x2x1
jax: 0.10.0
libtpu: 0.0.40
codegen_flags: <defaults>
</compile_context>

<pallas_src>
import functools

import jax
import jax.numpy as jnp
from jax import lax
from jax.experimental import pallas as pl
from jax.experimental.pallas import tpu as pltpu


def _round_up(x, m):
    return (x + m - 1) // m * m


def _vmem_limit_bytes(needed_bytes):
    """Generation-aware scoped-VMEM request (v5e default 16 MiB scoped,
    v6e/v7x 32 MiB; v7x physical 64 MiB)."""
    try:
        cap = int(pltpu.get_tpu_info().vmem_capacity_bytes)
    except Exception:
        cap = 64 << 20  # conservative: v7x physical per-core VMEM
    limit = min(max(needed_bytes + (4 << 20), 32 << 20), cap - (4 << 20))
    return int(max(limit, 16 << 20))


# --------------------------------------------------------------------------
# Kernel 1: atype 0/1/2  (neg() scaling + Godel t-norm (min) + hinge L1)
#   idx_ref : VMEM (TB, 4) int32   columns = [leftA, leftB, rightA, rightB]
#   scl_ref : VMEM (TB, 4) f32     matching neg() scales
#   cemb_ref: VMEM (C, D)  f32     resident 2-D concept table
#   out_ref : VMEM (8, D)  f32     lane-dense per-block partial sums
# --------------------------------------------------------------------------
def _simple_loss_kernel(left_pair, right_pair, idx_ref, scl_ref, cemb_ref,
                        out_ref):
    tb = idx_ref.shape[0]
    C = cemb_ref.shape[0]
    idx = idx_ref[...]
    scl = scl_ref[...]
    cemb = cemb_ref[...]
    col_iota = lax.broadcasted_iota(jnp.int32, (tb, C), 1)

    def gather(col):
        # One-hot MXU gather: one-hot values are exactly 0/1 and HIGHEST keeps
        # the f32 embedding values exact (bit-parity with the XLA reference).
        onehot = (col_iota == idx[:, col:col + 1]).astype(jnp.float32)
        e = jnp.dot(onehot, cemb,
                    preferred_element_type=jnp.float32,
                    precision=lax.Precision.HIGHEST)            # (TB, D)
        return scl[:, col:col + 1] * e

    lefte = gather(0)
    if left_pair:                                               # Godel min
        lefte = jnp.minimum(lefte, gather(1))
    righte = gather(2)
    if right_pair:
        righte = jnp.minimum(righte, gather(3))

    hinge = jnp.maximum(lefte - righte, 0.0)                    # (TB, D)
    # Reduce TB -> 8 sublanes so the store is one full unmasked (8, D) tile.
    out_ref[...] = hinge.reshape(tb // 8, 8, hinge.shape[1]).sum(axis=0)


def simple_loss(cEmb, idx, scl, *, left_pair, right_pair, tile_b=512):
    C, D = cEmb.shape
    B = idx.shape[0]
    # Bound the in-kernel (TB, C) one-hot intermediate to ~2 MiB of f32.
    max_tb = max(8, ((2 << 20) // max(4 * C, 1)) // 8 * 8)
    tile_b = int(max(8, min(tile_b, max_tb, _round_up(B, 8))))
    tile_b = _round_up(tile_b, 8)
    num_blocks = pl.cdiv(B, tile_b)
    b_pad = num_blocks * tile_b

    # Padded rows: idx == 0 and scale == 1.0 on both sides -> hinge is exactly 0.
    idx_p = jnp.zeros((b_pad, 4), jnp.int32).at[:B].set(idx.astype(jnp.int32))
    scl_p = jnp.ones((b_pad, 4), jnp.float32).at[:B].set(scl.astype(jnp.float32))
    cEmb = cEmb.astype(jnp.float32)

    needed = (2 * C * D * 4                       # double-buffered resident cEmb
              + 2 * 2 * tile_b * 4 * 128 * 4      # idx/scl blocks (lane padded)
              + 2 * 8 * D * 4                     # output blocks
              + 6 * tile_b * max(C, D) * 4)       # one-hot / gathered temporaries

    kernel = functools.partial(_simple_loss_kernel, left_pair, right_pair)
    out = pl.pallas_call(
        kernel,
        out_shape=jax.ShapeDtypeStruct((num_blocks * 8, D), jnp.float32),
        grid=(num_blocks,),
        in_specs=[
            pl.BlockSpec((tile_b, 4), lambda i: (i, 0)),
            pl.BlockSpec((tile_b, 4), lambda i: (i, 0)),
            pl.BlockSpec((C, D), lambda i: (0, 0)),   # resident, constant map
        ],
        out_specs=pl.BlockSpec((8, D), lambda i: (i, 0)),
        compiler_params=pltpu.CompilerParams(
            dimension_semantics=("parallel",),
            vmem_limit_bytes=_vmem_limit_bytes(needed)),
    )(idx_p, scl_p, cEmb)
    return jnp.sum(out) / B


# --------------------------------------------------------------------------
# Kernel 2: atype 3/4/5/6  (Godel exist / forall over role matrices)
#   ridx_ref: SMEM (Bpad,) int32    role index per row
#   c_ref   : VMEM (TB, 1, D) f32   pre-gathered + scaled concept rows
#   x_ref   : VMEM (TB, 1, D) f32   pre-gathered + scaled quantified rows
#   remb_ref: VMEM (R, D, D)  f32   resident role table (1 - r pre-applied
#                                   wrapper-side for the forall path)
#   out_ref : VMEM (8, D)     f32   lane-dense per-block partial sums
# --------------------------------------------------------------------------
def _quant_loss_kernel(is_exist, quant_on_left, batch, tile_b,
                       ridx_ref, c_ref, x_ref, remb_ref, out_ref):
    i = pl.program_id(0)
    D = remb_ref.shape[2]

    def body(j, acc):
        b = i * tile_b + j
        r = remb_ref[pl.ds(ridx_ref[b], 1), :, :]           # (1, D, D)
        x = x_ref[j].reshape(1, 1, D)                       # (1, 1, D)
        c = c_ref[j]                                        # (1, D)
        if is_exist:
            # exist:  max_j min(r[i, j], x[j])
            q = jnp.max(jnp.minimum(r, x), axis=2)          # (1, D)
        else:
            # forall: min_j max(1 - r[i, j], x[j]); (1 - r) hoisted to wrapper.
            q = jnp.min(jnp.maximum(r, x), axis=2)          # (1, D)
        if quant_on_left:
            hinge = jnp.maximum(q - c, 0.0)
        else:
            hinge = jnp.maximum(c - q, 0.0)
        valid = (b < batch).astype(jnp.float32)             # scalar 0/1 mask
        return acc + valid * hinge

    acc = lax.fori_loop(0, tile_b, body, jnp.zeros((1, D), jnp.float32),
                        unroll=2)
    out_ref[...] = jnp.concatenate(
        [acc, jnp.zeros((7, D), jnp.float32)], axis=0)


def quant_loss(cEmb, rEmb, *, ridx, cidx, xidx, sc, sx, is_exist,
               quant_on_left, tile_b=128):
    C, D = cEmb.shape
    R = rEmb.shape[0]
    B = ridx.shape[0]
    tile_b = int(max(8, min(tile_b, _round_up(B, 8))))
    tile_b = _round_up(tile_b, 8)
    num_blocks = pl.cdiv(B, tile_b)
    b_pad = num_blocks * tile_b

    cEmb = cEmb.astype(jnp.float32)
    # Concept gathers + neg() scaling hoisted to XLA (exact, vectorized).
    c_g = sc[:, None].astype(jnp.float32) * cEmb[cidx]                # (B, D)
    x_g = sx[:, None].astype(jnp.float32) * cEmb[xidx]                # (B, D)
    # (TB,1,D) blocks trade a small per-tile sublane pad for safe leading-dim
    # dynamic indexing inside the kernel.
    c_g = jnp.zeros((b_pad, 1, D), jnp.float32).at[:B, 0].set(c_g)
    x_g = jnp.zeros((b_pad, 1, D), jnp.float32).at[:B, 0].set(x_g)
    ridx_p = jnp.zeros((b_pad,), jnp.int32).at[:B].set(ridx.astype(jnp.int32))

    # Hoist the forall (1 - r) once per call instead of once per batch row.
    r_tab = rEmb.astype(jnp.float32)
    if not is_exist:
        r_tab = 1.0 - r_tab

    needed = (2 * R * D * D * 4                  # double-buffered resident roles
              + 2 * 2 * tile_b * 8 * D * 4       # c/x streamed blocks (padded)
              + 2 * 8 * D * 4                    # output blocks
              + 6 * D * D * 4)                   # per-row temporaries

    kernel = functools.partial(_quant_loss_kernel, is_exist, quant_on_left,
                               B, tile_b)
    out = pl.pallas_call(
        kernel,
        out_shape=jax.ShapeDtypeStruct((num_blocks * 8, D), jnp.float32),
        grid=(num_blocks,),
        in_specs=[
            pl.BlockSpec(memory_space=pltpu.MemorySpace.SMEM),      # role idx
            pl.BlockSpec((tile_b, 1, D), lambda i: (i, 0, 0)),      # c rows
            pl.BlockSpec((tile_b, 1, D), lambda i: (i, 0, 0)),      # x rows
            pl.BlockSpec((R, D, D), lambda i: (0, 0, 0)),           # resident roles
        ],
        out_specs=pl.BlockSpec((8, D), lambda i: (i, 0)),
        compiler_params=pltpu.CompilerParams(
            dimension_semantics=("parallel",),
            vmem_limit_bytes=_vmem_limit_bytes(needed)),
    )(ridx_p, c_g, x_g, r_tab)
    return jnp.sum(out) / B


# --------------------------------------------------------------------------
# DFALC module (Godel logic), Pallas-backed forward
# --------------------------------------------------------------------------
class DFALCPallas:
    def __init__(self, cEmb_init, rEmb_init, name="Godel"):
        assert name == "Godel"  # reference module default
        self.cEmb = jnp.asarray(cEmb_init, jnp.float32)
        self.rEmb = jnp.asarray(rEmb_init, jnp.float32)
        self.epsilon = 0.01
        self.p = 2

    def forward(self, batch, atype):
        left, right, negf = batch
        negf = negf.astype(jnp.float32)
        B = negf.shape[0]

        # Replicates: cEmb[-1].masked_fill_(>0, 1.0); cEmb[-2].masked_fill_(<1, 0.0)
        # TODO(synk): torch mutates the parameter persistently; here it is
        # recomputed functionally each forward (matches the pure-JAX reference).
        cEmb = self.cEmb
        cEmb = cEmb.at[-1, :].set(jnp.where(cEmb[-1, :] > 0.0, 1.0, cEmb[-1, :]))
        cEmb = cEmb.at[-2, :].set(jnp.where(cEmb[-2, :] < 1.0, 0.0, cEmb[-2, :]))
        rEmb = self.rEmb

        def s(f):                      # neg(): negf -> (-2*negf + 1) scale
            return f.astype(jnp.float32) * -2.0 + 1.0

        zeros_i = jnp.zeros((B,), jnp.int32)
        ones_f = jnp.ones((B,), jnp.float32)

        if atype == 0:
            idx = jnp.stack([left, zeros_i, right, zeros_i], axis=1)
            scl = jnp.stack([s(-negf[:, 0]), ones_f, s(negf[:, 1]), ones_f], axis=1)
            return simple_loss(cEmb, idx, scl, left_pair=False, right_pair=False)
        elif atype == 1:
            idx = jnp.stack([left[:, 0], left[:, 1], right, zeros_i], axis=1)
            scl = jnp.stack([s(negf[:, 0]), s(negf[:, 1]), s(negf[:, 2]), ones_f],
                            axis=1)
            return simple_loss(cEmb, idx, scl, left_pair=True, right_pair=False)
        elif atype == 2:
            idx = jnp.stack([left, zeros_i, right[:, 0], right[:, 1]], axis=1)
            scl = jnp.stack([s(negf[:, 0]), ones_f, s(negf[:, 1]), s(negf[:, 2])],
                            axis=1)
            return simple_loss(cEmb, idx, scl, left_pair=False, right_pair=True)
        elif atype in (3, 4):
            # lefte = neg(cEmb[left]); righte = exist/forall(rEmb[r0], neg(cEmb[r1]))
            return quant_loss(cEmb, rEmb,
                              ridx=right[:, 0], cidx=left, xidx=right[:, 1],
                              sc=s(negf[:, 0]), sx=s(negf[:, 1]),
                              is_exist=(atype == 3), quant_on_left=False)
        elif atype in (5, 6):
            # lefte = exist/forall(rEmb[l0], neg(cEmb[l1])); righte = neg(cEmb[right])
            return quant_loss(cEmb, rEmb,
                              ridx=left[:, 0], cidx=right, xidx=left[:, 1],
                              sc=s(negf[:, 1]), sx=s(negf[:, 0]),
                              is_exist=(atype == 5), quant_on_left=True)
        else:
            raise ValueError(f"unknown atype {atype}")


# --------------------------------------------------------------------------
# Pure-JAX reference (mirror of the torch code, Godel logic) for validation
# --------------------------------------------------------------------------
def _ref_loss(cEmb, rEmb, batch, atype):
    left, right, negf = batch
    negf = negf.astype(jnp.float32)
    cEmb = jnp.asarray(cEmb, jnp.float32)
    rEmb = jnp.asarray(rEmb, jnp.float32)
    cEmb = cEmb.at[-1, :].set(jnp.where(cEmb[-1, :] > 0.0, 1.0, cEmb[-1, :]))
    cEmb = cEmb.at[-2, :].set(jnp.where(cEmb[-2, :] < 1.0, 0.0, cEmb[-2, :]))

    def neg(x, f):
        return (f[:, None] * -2.0 + 1.0) * x

    def t_norm(x, y):
        return jnp.minimum(x, y)

    def t_cnorm(x, y):
        return jnp.maximum(x, y)

    def forall(r, x):
        return jnp.min(t_cnorm(1.0 - r, x[:, None, :]), axis=2)

    def exist(r, x):
        return jnp.max(t_norm(r, x[:, None, :]), axis=2)

    if atype == 0:
        lefte = neg(cEmb[left], -negf[:, 0]); righte = neg(cEmb[right], negf[:, 1])
    elif atype == 1:
        lefte = t_norm(neg(cEmb[left[:, 0]], negf[:, 0]),
                       neg(cEmb[left[:, 1]], negf[:, 1]))
        righte = neg(cEmb[right], negf[:, 2])
    elif atype == 2:
        lefte = neg(cEmb[left], negf[:, 0])
        righte = t_norm(neg(cEmb[right[:, 0]], negf[:, 1]),
                        neg(cEmb[right[:, 1]], negf[:, 2]))
    elif atype == 3:
        lefte = neg(cEmb[left], negf[:, 0])
        righte = exist(rEmb[right[:, 0]], neg(cEmb[right[:, 1]], negf[:, 1]))
    elif atype == 4:
        lefte = neg(cEmb[left], negf[:, 0])
        righte = forall(rEmb[right[:, 0]], neg(cEmb[right[:, 1]], negf[:, 1]))
    elif atype == 5:
        lefte = exist(rEmb[left[:, 0]], neg(cEmb[left[:, 1]], negf[:, 0]))
        righte = neg(cEmb[right], negf[:, 1])
    else:
        lefte = forall(rEmb[left[:, 0]], neg(cEmb[left[:, 1]], negf[:, 0]))
        righte = neg(cEmb[right], negf[:, 1])
    return jnp.mean(jnp.sum(jnp.maximum(lefte - righte, 0.0), axis=1))


# --------------------------------------------------------------------------
if __name__ == "__main__":
    key = jax.random.PRNGKey(0)
    conceptSize, roleSize, D, B = 12, 4, 128, 8
    k1, k2, k3, k4, k5, k6 = jax.random.split(key, 6)

    cEmb_init = jax.random.uniform(k1, (conceptSize, D), jnp.float32)
    rEmb_init = jax.random.uniform(k2, (roleSize, D, D), jnp.float32)

    left_pair = jax.random.randint(k3, (B, 2), 0, conceptSize)
    right_pair = jax.random.randint(k4, (B, 2), 0, conceptSize)
    negf = jax.random.randint(k5, (B, 3), 0, 2)
    role_idx = jax.random.randint(k6, (B,), 0, roleSize)

    model = DFALCPallas(cEmb_init, rEmb_init, name="Godel")

    for atype in range(7):
        if atype == 0:
            batch = (left_pair[:, 0], right_pair[:, 0], negf)
        elif atype == 1:
            batch = (left_pair, right_pair[:, 0], negf)
        elif atype == 2:
            batch = (left_pair[:, 0], right_pair, negf)
        elif atype in (3, 4):
            right = jnp.stack([role_idx, right_pair[:, 1]], axis=1)
            batch = (left_pair[:, 0], right, negf)
        else:  # 5, 6
            left = jnp.stack([role_idx, left_pair[:, 1]], axis=1)
            batch = (left, right_pair[:, 0], negf)

        loss = jax.block_until_ready(model.forward(batch, atype))
        ref = jax.block_until_ready(_ref_loss(cEmb_init, rEmb_init, batch, atype))
        tol = 1e-3 + 1e-5 * abs(float(ref))
        assert abs(float(loss) - float(ref)) < tol, (atype, float(loss), float(ref))

    print("KERNEL_OK")
</pallas_src>

<mosaic_0001>
module attributes {stable_mosaic.version = 11 : i64} {
  func.func @_simple_loss_kernel(%arg0: i32, %arg1: memref<8x4xi32, #tpu.memory_space<vmem>>, %arg2: memref<8x4xf32, #tpu.memory_space<vmem>>, %arg3: memref<12x128xf32, #tpu.memory_space<vmem>>, %arg4: memref<8x128xf32, #tpu.memory_space<vmem>>) attributes {dimension_semantics = [#tpu.dimension_semantics<parallel>], iteration_bounds = array<i64: 1>, scalar_prefetch = 0 : i64, scratch_operands = 0 : i64, tpu.core_type = #tpu.core_type<tc>, window_params = [{transform_indices = @transform_0, window_bounds = array<i64: 8, 4>}, {transform_indices = @transform_1, window_bounds = array<i64: 8, 4>}, {pipeline_mode = #tpu.pipeline_mode<synchronous>, transform_indices = @transform_2, window_bounds = array<i64: 12, 128>}, {transform_indices = @transform_3, window_bounds = array<i64: 8, 128>}]} {
    %c0 = arith.constant 0 : index
    %c0_0 = arith.constant 0 : index
    %0 = vector.load %arg1[%c0, %c0_0] : memref<8x4xi32, #tpu.memory_space<vmem>>, vector<8x4xi32>
    %c0_1 = arith.constant 0 : index
    %c0_2 = arith.constant 0 : index
    %1 = vector.load %arg2[%c0_1, %c0_2] : memref<8x4xf32, #tpu.memory_space<vmem>>, vector<8x4xf32>
    %c0_3 = arith.constant 0 : index
    %c0_4 = arith.constant 0 : index
    %2 = vector.load %arg3[%c0_3, %c0_4] : memref<12x128xf32, #tpu.memory_space<vmem>>, vector<12x128xf32>
    %3 = tpu.iota {dimensions = array<i32: 1>} : vector<8x12xi32>
    %4 = vector.extract_strided_slice %0 {offsets = [0, 0], sizes = [8, 1], strides = [1, 1]} : vector<8x4xi32> to vector<8x1xi32>
    %5 = vector.broadcast %4 : vector<8x1xi32> to vector<8x12xi32>
    %6 = arith.cmpi eq, %3, %5 : vector<8x12xi32>
    %7 = arith.extui %6 : vector<8x12xi1> to vector<8x12xi32>
    %8 = arith.sitofp %7 : vector<8x12xi32> to vector<8x12xf32>
    %cst = arith.constant dense<0.000000e+00> : vector<8x128xf32>
    %9 = tpu.matmul %8, %2, %cst {dimension_numbers = #tpu.dot_dimension_numbers<[1], [0], [0], [1], [0, 0, 1, 1], [], []>, precision = #tpu.contract_precision<fp32>} : vector<8x12xf32>, vector<12x128xf32>, vector<8x128xf32> -> vector<8x128xf32>
    %10 = vector.extract_strided_slice %1 {offsets = [0, 0], sizes = [8, 1], strides = [1, 1]} : vector<8x4xf32> to vector<8x1xf32>
    %11 = vector.broadcast %10 : vector<8x1xf32> to vector<8x128xf32>
    %12 = arith.mulf %11, %9 : vector<8x128xf32>
    %13 = vector.extract_strided_slice %0 {offsets = [0, 2], sizes = [8, 1], strides = [1, 1]} : vector<8x4xi32> to vector<8x1xi32>
    %14 = vector.broadcast %13 : vector<8x1xi32> to vector<8x12xi32>
    %15 = arith.cmpi eq, %3, %14 : vector<8x12xi32>
    %16 = arith.extui %15 : vector<8x12xi1> to vector<8x12xi32>
    %17 = arith.sitofp %16 : vector<8x12xi32> to vector<8x12xf32>
    %cst_5 = arith.constant dense<0.000000e+00> : vector<8x128xf32>
    %18 = tpu.matmul %17, %2, %cst_5 {dimension_numbers = #tpu.dot_dimension_numbers<[1], [0], [0], [1], [0, 0, 1, 1], [], []>, precision = #tpu.contract_precision<fp32>} : vector<8x12xf32>, vector<12x128xf32>, vector<8x128xf32> -> vector<8x128xf32>
    %19 = vector.extract_strided_slice %1 {offsets = [0, 2], sizes = [8, 1], strides = [1, 1]} : vector<8x4xf32> to vector<8x1xf32>
    %20 = vector.broadcast %19 : vector<8x1xf32> to vector<8x128xf32>
    %21 = arith.mulf %20, %18 : vector<8x128xf32>
    %22 = arith.subf %12, %21 : vector<8x128xf32>
    %cst_6 = arith.constant 0.000000e+00 : f32
    %23 = vector.broadcast %cst_6 : f32 to vector<8x128xf32>
    %24 = arith.maximumf %22, %23 : vector<8x128xf32>
    %25 = vector.shape_cast %24 : vector<8x128xf32> to vector<1x8x128xf32>
    %cst_7 = arith.constant dense<0.000000e+00> : vector<8x128xf32>
    %26 = vector.multi_reduction <add>, %25, %cst_7 [0] : vector<1x8x128xf32> to vector<8x128xf32>
    %c0_8 = arith.constant 0 : index
    %c0_9 = arith.constant 0 : index
    %27 = vector.load %arg4[%c0_8, %c0_9] : memref<8x128xf32, #tpu.memory_space<vmem>>, vector<8x128xf32>
    tpu.vector_store %arg4[%c0_8, %c0_9], %26 {strides = array<i32>} : memref<8x128xf32, #tpu.memory_space<vmem>>, vector<8x128xf32>,
    return
  }
  func.func @transform_0(%arg0: i32) -> (i32, i32) {
    %c0_i32 = arith.constant 0 : i32
    %c0_i32_0 = arith.constant 0 : i32
    return %arg0, %c0_i32 : i32, i32
  }
  func.func @transform_1(%arg0: i32) -> (i32, i32) {
    %c0_i32 = arith.constant 0 : i32
    %c0_i32_0 = arith.constant 0 : i32
    return %arg0, %c0_i32 : i32, i32
  }
  func.func @transform_2(%arg0: i32) -> (i32, i32) {
    %c0_i32 = arith.constant 0 : i32
    %c0_i32_0 = arith.constant 0 : i32
    %c0_i32_1 = arith.constant 0 : i32
    return %c0_i32, %c0_i32_0 : i32, i32
  }
  func.func @transform_3(%arg0: i32) -> (i32, i32) {
    %c0_i32 = arith.constant 0 : i32
    %c0_i32_0 = arith.constant 0 : i32
    return %arg0, %c0_i32 : i32, i32
  }
}

</mosaic_0001>

<bundles_post_ra>
// kernel: tpu_custom_call.1
= control target key start
LH: loop header
LB: loop body
LE: loop exit
PB: predicated region body
PF: predicated region fallthrough
CT: control target
= control target key end

     0   :  { %s1313_s0 = inlined_call_operand.vmem [shape: s32[8,4], index: 0, kind: input, shape index: {}]   ;;  %s1314_s1 = inlined_call_operand.vmem [shape: f32[8,4], index: 1, kind: input, shape index: {}]   ;;  %s1315_s2 = inlined_call_operand.vmem [shape: f32[12,128], index: 2, kind: input, shape index: {}]   ;;  %s1316_s3 = inlined_call_operand.hbm [shape: f32[8,128], index: 3, kind: output, shape index: {}]  }
   0x1   :  { %v15_v0 = vld [vmem:[%s1313_s0] sm:$0xff] }
   0x2   :  { %8 = vsyncpa [#allocation3], 0  ;;  %v1209_v1 = vmov 0   ;;  %v18_v2 = vld [vmem:[%s1315_s2 + $0x8] sm:$0xf]  ;;  %vm31_vm0 = vcmask 1043456   ;;  %v19_v23 = vlaneseq }
   0x3   :  { %1181 = vset.pattern.permute.xlu0 %v1209_v1  ;;  %1183 = vset.pattern.permute.xlu1 %v1209_v1  ;;  %v17_v3 = vld [vmem:[%s1315_s2] sm:$0xff]  ;;  %v33_v4 = vsel %vm31_vm0, %v18_v2, 0  ;;  %v1210_v5 = vmov 2   ;;  %v1211_v11 = vmov 0.0|0.0   ;;  %vm1212_vm1 = vmmov 0  }
   0x4   :  { %22 = vperm.xlu0 %1181, %v15_v0   ;;  %v36_v6 = vand.u32 4294901760, %v17_v3  ;;  %v39_v7 = vand.u32 4294901760, %v33_v4  ;;  %1119 = vmatprep.subr.bf16.mxu0 %v1211_v11  ;;  %v1213_v14 = vmov 0.0   ;;  %v16_v22 = vld [vmem:[%s1314_s1] sm:$0xff]  ;;  %v20_v24 = vand.u32 127, %v19_v23  ;;  %s1214_s1 = smov [#allocation2]  }
   0x5   :  { %1137 = vmatprep.subr.bf16.mxu1 %v1211_v11  ;;  %1039 = vmatprep.mubr.msk.f32.mxu0 %vm1212_vm1, %v1213_v14  ;;  %vm27_vm2 = vcmask 97280   ;;  %s983_s18 = sshll.u32 %s1214_s1, 4  ;;  %s984_s18 = int_to_ptr.vmem [resolvable:$true] %s983_s18 }
   0x6   :  { %v1244_v8 = vpack.c.bf16 %v39_v7, %v36_v6  ;;  %v114_v9 = vsub.f32 %v17_v3, %v36_v6  ;;  %v121_v10 = vsub.f32 %v33_v4, %v39_v7  ;;  %1081 = vmatprep.mubr.msk.f32.mxu1 %vm1212_vm1, %v1213_v14  ;;  %496 = vperm.xlu1 %1183, %v16_v22   ;;  %s1185_s19 = scalar_lea.vmem %s984_s18, 128  ;;  %p1190_p1 = scmp.lt.s32.totalorder %s984_s18, %s984_s18 }
   0x7   :  { %p1186_p0 = scmp.ne.s32.totalorder %s984_s18, %s1185_s19  ;;  %p1191_p2 = scmp.lt.s32.totalorder %s1185_s19, %s1185_s19 }
   0x8   :  { %1182 = vset.pattern.permute.xlu0 %v1210_v5  ;;  %1121 = vmatpush3.bf16.msra.mxu0 %v1244_v8  ;;  %v115_v12 = vand.u32 4294901760, %v114_v9  ;;  %v122_v13 = vand.u32 4294901760, %v121_v10  ;;  %v1126_v20 = vpack.c.bf16 %v121_v10, %v114_v9 }
   0x9   :  { %501 = vperm.xlu0 %1182, %v15_v0   ;;  %1139 = vmatpush3.bf16.msra.mxu1 %v1244_v8  ;;  %p1192_p3 = por %p1191_p2, %p1190_p1 }
   0xa   :  { %1122 = vmatprep.subr.bf16.mxu0 %v1211_v11  ;;  %1140 = vmatprep.subr.bf16.mxu1 %v1211_v11  ;;  %v116_v15 = vsub.f32 %v114_v9, %v115_v12  ;;  %v123_v16 = vsub.f32 %v121_v10, %v122_v13  ;;  %v1132_v21 = vpack.c.bf16 %v122_v13, %v115_v12 }
   0xb   :  { %1184 = vset.pattern.permute.xlu1 %v1210_v5  ;;  %p1193_p4 = pnand %p1192_p3, %p1186_p0 }
   0xc   :  { %v117_v17 = vand.u32 4294901760, %v116_v15  ;;  %v124_v18 = vand.u32 4294901760, %v123_v16  ;;  %969 = vperm.xlu1 %1184, %v16_v22  }
   0xe   :  { %v1123_v19 = vpack.c.bf16 %v124_v18, %v117_v17 }
  0x83   :  { %v23_v25 = vpop.permute.xlu0 %22 }
  0x84   :  { %vm24_vm3 = vcmp.eq.s32.totalorder %v20_v24, %v23_v25 }
  0x85   :  { %v991_v26 = vsel %vm24_vm3, 1.0, %v1213_v14  ;;  %v497_v39 = vpop.permute.xlu1 %496 }
  0x86   :  { %v29_v27 = vsel %vm27_vm2, %v991_v26, 0 }
  0x87   :  { %v103_v28 = vsub.f32 %v29_v27, %v29_v27 }
  0x88   :  { %v502_v29 = vpop.permute.xlu0 %501 }
  0x89   :  { %vm503_vm4 = vcmp.eq.s32.totalorder %v20_v24, %v502_v29  ;;  %v104_v30 = vand.u32 4294901760, %v103_v28 }
  0x8a   :  { %v995_v31 = vsel %vm503_vm4, 1.0, %v1213_v14 }
  0x8b   :  { %v507_v32 = vsel %vm27_vm2, %v995_v31, 0  ;;  %v105_v33 = vsub.f32 %v103_v28, %v104_v30  ;;  %v970_v42 = vpop.permute.xlu1 %969 }
  0x8c   :  { %v577_v34 = vsub.f32 %v507_v32, %v507_v32 }
  0x8d   :  { %v106_v35 = vand.u32 4294901760, %v105_v33 }
  0x8e   :  { %v578_v36 = vand.u32 4294901760, %v577_v34 }
  0x8f   :  { %1040 = vmatmul.mubr.f32.vlgmr.msra.gmra.mrb[0].mxu0 %v106_v35 }
  0x90   :  { %1124 = vmatpush3.bf16.msra.mxu0 %v1123_v19  ;;  %v579_v37 = vsub.f32 %v577_v34, %v578_v36  ;;  %1046 = vmatprep.mubr.msk.f32.mxu0 %vm1212_vm1, %v1213_v14 }
  0x91   :  { %1125 = vmatprep.subr.bf16.mxu0 %v1211_v11 }
  0x92   :  { %v580_v38 = vand.u32 4294901760, %v579_v37 }
  0x94   :  { %1082 = vmatmul.mubr.f32.vlgmr.msra.gmra.mrb[0].mxu1 %v580_v38 }
  0x95   :  { %1142 = vmatpush3.bf16.msra.mxu1 %v1123_v19  ;;  %1088 = vmatprep.mubr.msk.f32.mxu1 %vm1212_vm1, %v1213_v14 }
  0x96   :  { %1143 = vmatprep.subr.bf16.mxu1 %v1211_v11 }
  0x97   :  { %1047 = vmatmul.mubr.msk.f32.vlgmr.msra.gmra.mrb[0].mxu0 %vm27_vm2, %v991_v26 }
  0x98   :  { %1127 = vmatpush3.bf16.msra.mxu0 %v1126_v20  ;;  %1053 = vmatprep.mubr.msk.f32.mxu0 %vm1212_vm1, %v1213_v14 }
  0x99   :  { %1128 = vmatprep.subr.bf16.mxu0 %v1211_v11 }
  0x9c   :  { %1089 = vmatmul.mubr.msk.f32.vlgmr.msra.gmra.mrb[0].mxu1 %vm27_vm2, %v995_v31 }
  0x9d   :  { %1145 = vmatpush3.bf16.msra.mxu1 %v1126_v20  ;;  %1095 = vmatprep.mubr.msk.f32.mxu1 %vm1212_vm1, %v1213_v14 }
  0x9e   :  { %1146 = vmatprep.subr.bf16.mxu1 %v1211_v11 }
  0x9f   :  { %1054 = vmatmul.mubr.f32.vlgmr.msra.gmra.mrb[0].mxu0 %v103_v28 }
  0xa0   :  { %1130 = vmatpush3.bf16.msra.mxu0 %v1244_v8  ;;  %1060 = vmatprep.mubr.msk.f32.mxu0 %vm1212_vm1, %v1213_v14 }
  0xa1   :  { %1131 = vmatprep.subr.bf16.mxu0 %v1211_v11 }
  0xa4   :  { %1096 = vmatmul.mubr.f32.vlgmr.msra.gmra.mrb[0].mxu1 %v577_v34 }
  0xa5   :  { %1148 = vmatpush3.bf16.msra.mxu1 %v1244_v8  ;;  %1102 = vmatprep.mubr.msk.f32.mxu1 %vm1212_vm1, %v1213_v14 }
  0xa6   :  { %1149 = vmatprep.subr.bf16.mxu1 %v1211_v11 }
  0xa7   :  { %1061 = vmatmul.mubr.f32.vlgmr.msra.gmra.mrb[0].mxu0 %v104_v30 }
  0xa8   :  { %1133 = vmatpush3.bf16.msra.mxu0 %v1132_v21  ;;  %1067 = vmatprep.mubr.msk.f32.mxu0 %vm1212_vm1, %v1213_v14 }
  0xa9   :  { %1134 = vmatprep.subr.bf16.mxu0 %v1211_v11 }
  0xac   :  { %1103 = vmatmul.mubr.f32.vlgmr.msra.gmra.mrb[0].mxu1 %v578_v36 }
  0xad   :  { %1151 = vmatpush3.bf16.msra.mxu1 %v1132_v21  ;;  %1109 = vmatprep.mubr.msk.f32.mxu1 %vm1212_vm1, %v1213_v14 }
  0xae   :  { %1152 = vmatprep.subr.bf16.mxu1 %v1211_v11 }
  0xaf   :  { %1068 = vmatmul.mubr.msk.f32.vlgmr.msra.gmra.mrb[0].mxu0 %vm27_vm2, %v991_v26 }
  0xb0   :  { %1136 = vmatpush3.bf16.msra.mxu0 %v1244_v8  ;;  %1074 = vmatprep.mubr.msk.f32.mxu0 %vm1212_vm1, %v1213_v14 }
  0xb4   :  { %1110 = vmatmul.mubr.msk.f32.vlgmr.msra.gmra.mrb[0].mxu1 %vm27_vm2, %v995_v31 }
  0xb5   :  { %1154 = vmatpush3.bf16.msra.mxu1 %v1244_v8  ;;  %1116 = vmatprep.mubr.msk.f32.mxu1 %vm1212_vm1, %v1213_v14 }
  0xb7   :  { %1075 = vmatmul.mubr.msk.f32.vlgmr.msra.gmra.mrb[0].mxu0 %vm27_vm2, %v991_v26 }
  0xbc   :  { %1117 = vmatmul.mubr.msk.f32.vlgmr.msra.gmra.mrb[0].mxu1 %vm27_vm2, %v995_v31 }
 0x18a   :  { %v490_v40 = vpop.f32.mrb[0].mxu0 }
 0x18b   :  { %v1076_v41 = vpop.f32.mrb[1].mxu0  ;;  %v499_v44 = vmul.f32 %v497_v39, %v490_v40 }
 0x18f   :  { %v964_v43 = vpop.f32.mrb[0].mxu1 }
 0x190   :  { %v972_v45 = vmul.f32 %v970_v42, %v964_v43  ;;  %v1118_v46 = vpop.f32.mrb[1].mxu1 }
 0x192   :  { %v973_v47 = vsub.f32 %v499_v44, %v972_v45 }
 0x194   :  { %v974_v48 = vmax.f32 %v973_v47, 0.0 }
 0x196   :  { %976 = vst [vmem:[#allocation2] sm:$0xff] %v974_v48 }
 0x197   :  { %1196 = shalt.err (!%p1193_p4)
}
 0x198   :  { %s1197_s22 = scalar_lea.hbm %s1316_s3, 128 }
 0x199   :  { %p1198_p5 = scmp.ne.s32.totalorder %s1316_s3, %s1197_s22  ;;  %p1201_p6 = scmp.lt.u32.totalorder %s1197_s22, %s1316_s3 }
 0x19b   :  { %p1203_p7 = pnand %p1201_p6, %p1198_p5 }
 0x19d   :  { %1206 = shalt.err (!%p1203_p7)
}
 0x19e   :  { %986 = dma.vmem_to_hbm [thread:$0]  %s984_s18, 128, %s1316_s3, [#allocation3]  }
 0x19f   :  { %1207 = dma.done.wait [#allocation3], 128  }
 0x1a0   :  { %1208 = vsyncadd [#allocation3], 4294967168 }
 0x1a1   :  { %990 = vsyncpa [#allocation3], 1 }

</bundles_post_ra>
